<compile_context>
chip_gen: v7x
topology: tpu7x:2x2x1
jax: 0.10.0
libtpu: 0.0.40
codegen_flags: <defaults>
</compile_context>

<pallas_src>
import functools

import jax
import jax.numpy as jnp
from jax.experimental import pallas as pl
from jax.experimental.pallas import tpu as pltpu

_SUBLANE = 8


def _round_up(n, m):
    return ((n + m - 1) // m) * m


def boltzmann_kernel(x_ref, w_ref, wt_ref, b_ref, c_ref, p_ref):
    x = x_ref[...]          # (tm, D)  f32
    w = w_ref[...]          # (D, H)   f32
    wt = wt_ref[...]        # (H, D)   f32 (pre-transposed in wrapper, tiny)
    b = b_ref[...]          # (1, H)
    c = c_ref[...]          # (1, D)

    # v = x @ W + b   -> (tm, H)   (MXU, f32 accumulation)
    v = jnp.dot(x, w, preferred_element_type=jnp.float32) + b
    # h = sigmoid(v)  (EUP path)
    h = jax.nn.sigmoid(v)
    # p = h @ W^T + c -> (tm, D)   plain dot against pre-transposed W_T:
    # no in-kernel transpose, no XLU work.
    p = jnp.dot(h, wt, preferred_element_type=jnp.float32) + c
    p_ref[...] = p.astype(p_ref.dtype)


def _cost(B, D, H):
    # Advisory only: two matmuls + one sigmoid per row, true (unpadded) traffic.
    return pl.CostEstimate(
        flops=4 * B * D * H,
        transcendentals=B * H,
        bytes_accessed=4 * (2 * B * D + 2 * D * H + H + D),
    )


@functools.partial(jax.jit, static_argnames=("block_b",))
def boltzmann_forward(x, W, b, c, *, block_b=1024):
    """x: (B, input_dim); W: (input_dim, hidden_dim); b: (hidden_dim,); c: (input_dim,)."""
    B, D = x.shape
    H = W.shape[1]

    W_t = W.T                 # 640 B at module shapes; avoids any in-kernel transpose
    b2 = b.reshape(1, H)
    c2 = c.reshape(1, D)
    vmem = pltpu.MemorySpace.VMEM

    if B <= block_b:
        # Whole problem in a single kernel step: no grid, no padding, no slicing.
        return pl.pallas_call(
            boltzmann_kernel,
            out_shape=jax.ShapeDtypeStruct((B, D), x.dtype),
            in_specs=[pl.BlockSpec(memory_space=vmem)] * 5,
            out_specs=pl.BlockSpec(memory_space=vmem),
            cost_estimate=_cost(B, D, H),
        )(x, W, W_t, b2, c2)

    # Large-batch fallback: tile over batch only, weights/biases resident.
    tm = _round_up(block_b, _SUBLANE)
    Bp = _round_up(B, tm)
    x_p = jnp.pad(x, ((0, Bp - B), (0, 0))) if Bp != B else x
    out = pl.pallas_call(
        boltzmann_kernel,
        out_shape=jax.ShapeDtypeStruct((Bp, D), x.dtype),
        grid=(Bp // tm,),
        in_specs=[
            pl.BlockSpec((tm, D), lambda i: (i, 0), memory_space=vmem),   # x tile
            pl.BlockSpec((D, H), lambda i: (0, 0), memory_space=vmem),    # W   (resident)
            pl.BlockSpec((H, D), lambda i: (0, 0), memory_space=vmem),    # W^T (resident)
            pl.BlockSpec((1, H), lambda i: (0, 0), memory_space=vmem),    # b   (resident)
            pl.BlockSpec((1, D), lambda i: (0, 0), memory_space=vmem),    # c   (resident)
        ],
        out_specs=pl.BlockSpec((tm, D), lambda i: (i, 0), memory_space=vmem),
        compiler_params=pltpu.CompilerParams(
            dimension_semantics=("parallel",),
        ),
        cost_estimate=_cost(B, D, H),
    )(x_p, W, W_t, b2, c2)
    return out[:B] if Bp != B else out


if __name__ == "__main__":
    # Module shapes: input_dim = data.shape[1] = 5, hidden_dim = 32.
    input_dim = 5
    hidden_dim = 32
    batch = 256   # a realistic DataLoader batch over the 1000x5 dataset

    key = jax.random.PRNGKey(0)
    kx, kw, kb, kc = jax.random.split(key, 4)

    x = jax.random.normal(kx, (batch, input_dim), dtype=jnp.float32)
    W = jax.random.normal(kw, (input_dim, hidden_dim), dtype=jnp.float32)
    b = jax.random.normal(kb, (hidden_dim,), dtype=jnp.float32)
    c = jax.random.normal(kc, (input_dim,), dtype=jnp.float32)

    p = boltzmann_forward(x, W, b, c)
    p = jax.block_until_ready(p)

    # Pure-JAX reference (same math as the PyTorch forward).
    v_ref = x @ W + b
    h_ref = jax.nn.sigmoid(v_ref)
    p_ref = h_ref @ W.T + c

    assert p.shape == (batch, input_dim)
    assert jnp.allclose(p, p_ref, atol=1e-4, rtol=1e-4), (
        float(jnp.max(jnp.abs(p - p_ref))))

    print("KERNEL_OK")
</pallas_src>

<mosaic_0001>
module attributes {stable_mosaic.version = 11 : i64} {
  func.func @boltzmann_kernel(%arg0: memref<256x5xf32, #tpu.memory_space<vmem>>, %arg1: memref<5x32xf32, #tpu.memory_space<vmem>>, %arg2: memref<32x5xf32, #tpu.memory_space<vmem>>, %arg3: memref<1x32xf32, #tpu.memory_space<vmem>>, %arg4: memref<1x5xf32, #tpu.memory_space<vmem>>, %arg5: memref<256x5xf32, #tpu.memory_space<vmem>>) attributes {dimension_semantics = [], scalar_prefetch = 0 : i64, scratch_operands = 0 : i64, tpu.core_type = #tpu.core_type<tc>} {
    %c0 = arith.constant 0 : index
    %c0_0 = arith.constant 0 : index
    %0 = vector.load %arg0[%c0, %c0_0] : memref<256x5xf32, #tpu.memory_space<vmem>>, vector<256x5xf32>
    %c0_1 = arith.constant 0 : index
    %c0_2 = arith.constant 0 : index
    %1 = vector.load %arg1[%c0_1, %c0_2] : memref<5x32xf32, #tpu.memory_space<vmem>>, vector<5x32xf32>
    %c0_3 = arith.constant 0 : index
    %c0_4 = arith.constant 0 : index
    %2 = vector.load %arg2[%c0_3, %c0_4] : memref<32x5xf32, #tpu.memory_space<vmem>>, vector<32x5xf32>
    %c0_5 = arith.constant 0 : index
    %c0_6 = arith.constant 0 : index
    %3 = vector.load %arg3[%c0_5, %c0_6] : memref<1x32xf32, #tpu.memory_space<vmem>>, vector<1x32xf32>
    %c0_7 = arith.constant 0 : index
    %c0_8 = arith.constant 0 : index
    %4 = vector.load %arg4[%c0_7, %c0_8] : memref<1x5xf32, #tpu.memory_space<vmem>>, vector<1x5xf32>
    %cst = arith.constant dense<0.000000e+00> : vector<256x32xf32>
    %5 = tpu.matmul %0, %1, %cst {dimension_numbers = #tpu.dot_dimension_numbers<[1], [0], [0], [1], [0, 0, 1, 1], [], []>} : vector<256x5xf32>, vector<5x32xf32>, vector<256x32xf32> -> vector<256x32xf32>
    %6 = vector.broadcast %3 : vector<1x32xf32> to vector<256x32xf32>
    %7 = arith.addf %5, %6 : vector<256x32xf32>
    %8 = arith.negf %7 : vector<256x32xf32>
    %9 = math.exp %8 : vector<256x32xf32>
    %cst_9 = arith.constant 1.000000e+00 : f32
    %10 = vector.broadcast %cst_9 : f32 to vector<256x32xf32>
    %11 = arith.addf %10, %9 : vector<256x32xf32>
    %12 = arith.divf %10, %11 : vector<256x32xf32>
    %cst_10 = arith.constant dense<0.000000e+00> : vector<256x5xf32>
    %13 = tpu.matmul %12, %2, %cst_10 {dimension_numbers = #tpu.dot_dimension_numbers<[1], [0], [0], [1], [0, 0, 1, 1], [], []>} : vector<256x32xf32>, vector<32x5xf32>, vector<256x5xf32> -> vector<256x5xf32>
    %14 = vector.broadcast %4 : vector<1x5xf32> to vector<256x5xf32>
    %15 = arith.addf %13, %14 : vector<256x5xf32>
    %c0_11 = arith.constant 0 : index
    %c0_12 = arith.constant 0 : index
    %16 = vector.load %arg5[%c0_11, %c0_12] : memref<256x5xf32, #tpu.memory_space<vmem>>, vector<256x5xf32>
    tpu.vector_store %arg5[%c0_11, %c0_12], %15 {strides = array<i32>} : memref<256x5xf32, #tpu.memory_space<vmem>>, vector<256x5xf32>,
    return
  }
}

</mosaic_0001>

<bundles_post_ra>
// kernel: boltzmann_forward.1
= control target key start
LH: loop header
LB: loop body
LE: loop exit
PB: predicated region body
PF: predicated region fallthrough
CT: control target
= control target key end

     0   :  { %vm162_vm0 = vcmask 1044480   ;;  %vm65_vm1 = vcmask 39936   ;;  %vm589_vm2 = vcmask 261120   ;;  %s1764_s1 = inlined_call_operand.vmem [shape: f32[5,32], index: 1, kind: input, shape index: {}]   ;;  %s1765_s0 = inlined_call_operand.vmem [shape: f32[256,5], index: 0, kind: input, shape index: {}]   ;;  %s1766_s2 = inlined_call_operand.vmem [shape: f32[32,5], index: 2, kind: input, shape index: {}]   ;;  %s1767_s3 = inlined_call_operand.vmem [shape: f32[1,32], index: 3, kind: input, shape index: {}]   ;;  %s1768_s4 = inlined_call_operand.vmem [shape: f32[1,5], index: 4, kind: input, shape index: {}]   ;;  %s1769_s5 = inlined_call_operand.vmem [shape: f32[256,5], index: 5, kind: output, shape index: {}]  }
   0x1   :  { %v52_v0 = vld [vmem:[%s1764_s1] sm:$0x1f]  ;;  %v21_v2 = vld [vmem:[%s1765_s0 + $0x8] sm:$0xff]  ;;  %v22_v3 = vld [vmem:[%s1765_s0 + $0x10] sm:$0xff] }
   0x2   :  { %v20_v1 = vld [vmem:[%s1765_s0] sm:$0xff]  ;;  %1115 = vmatprep.subr.msk.mxu0 %vm162_vm0, %v52_v0  ;;  %v23_v4 = vld [vmem:[%s1765_s0 + $0x18] sm:$0xff]  ;;  %v25_v6 = vld [vmem:[%s1765_s0 + $0x28] sm:$0xff] }
   0x3   :  { %1117 = vmatprep.mubr.msk.f32.mxu0 %vm65_vm1, %v20_v1  ;;  %1116 = vmatpush3.msk.msra.mxu0 %vm162_vm0, %v52_v0  ;;  %v24_v5 = vld [vmem:[%s1765_s0 + $0x20] sm:$0xff]  ;;  %v26_v7 = vld [vmem:[%s1765_s0 + $0x30] sm:$0xff]  ;;  %v27_v8 = vld [vmem:[%s1765_s0 + $0x38] sm:$0xff] }
   0x4   :  { %1118 = vmatmul.mubr.msk.f32.vlgmr.msra.gmra.mrb[0].mxu0 %vm65_vm1, %v21_v2  ;;  %v28_v9 = vld [vmem:[%s1765_s0 + $0x40] sm:$0xff]  ;;  %v29_v10 = vld [vmem:[%s1765_s0 + $0x48] sm:$0xff]  ;;  %v30_v11 = vld [vmem:[%s1765_s0 + $0x50] sm:$0xff] }
   0x5   :  { %1120 = vmatprep.mubr.msk.f32.mxu0 %vm65_vm1, %v22_v3  ;;  %v31_v12 = vld [vmem:[%s1765_s0 + $0x58] sm:$0xff]  ;;  %v32_v13 = vld [vmem:[%s1765_s0 + $0x60] sm:$0xff]  ;;  %v33_v14 = vld [vmem:[%s1765_s0 + $0x68] sm:$0xff] }
   0x6   :  { %v34_v15 = vld [vmem:[%s1765_s0 + $0x70] sm:$0xff]  ;;  %v35_v16 = vld [vmem:[%s1765_s0 + $0x78] sm:$0xff]  ;;  %v36_v17 = vld [vmem:[%s1765_s0 + $0x80] sm:$0xff] }
   0x7   :  { %v37_v18 = vld [vmem:[%s1765_s0 + $0x88] sm:$0xff]  ;;  %v38_v19 = vld [vmem:[%s1765_s0 + $0x90] sm:$0xff]  ;;  %v39_v20 = vld [vmem:[%s1765_s0 + $0x98] sm:$0xff] }
   0x8   :  { %1121 = vmatmul.mubr.msk.f32.gmra.mrb[2].mxu0 %vm65_vm1, %v23_v4  ;;  %v40_v21 = vld [vmem:[%s1765_s0 + $0xa0] sm:$0xff]  ;;  %v41_v22 = vld [vmem:[%s1765_s0 + $0xa8] sm:$0xff]  ;;  %v42_v23 = vld [vmem:[%s1765_s0 + $0xb0] sm:$0xff] }
   0x9   :  { %1123 = vmatprep.mubr.msk.f32.mxu0 %vm65_vm1, %v24_v5  ;;  %v43_v24 = vld [vmem:[%s1765_s0 + $0xb8] sm:$0xff]  ;;  %v44_v25 = vld [vmem:[%s1765_s0 + $0xc0] sm:$0xff]  ;;  %v45_v26 = vld [vmem:[%s1765_s0 + $0xc8] sm:$0xff] }
   0xa   :  { %v46_v27 = vld [vmem:[%s1765_s0 + $0xd0] sm:$0xff]  ;;  %v47_v28 = vld [vmem:[%s1765_s0 + $0xd8] sm:$0xff]  ;;  %v48_v29 = vld [vmem:[%s1765_s0 + $0xe0] sm:$0xff] }
   0xb   :  { %v49_v30 = vld [vmem:[%s1765_s0 + $0xe8] sm:$0xff]  ;;  %v50_v31 = vld [vmem:[%s1765_s0 + $0xf0] sm:$0xff]  ;;  %v51_v32 = vld [vmem:[%s1765_s0 + $0xf8] sm:$0xff] }
   0xc   :  { %1124 = vmatmul.mubr.msk.f32.gmra.mrb[4].mxu0 %vm65_vm1, %v25_v6  ;;  %v53_v33 = vld [vmem:[%s1766_s2] sm:$0xff]  ;;  %v54_v34 = vld [vmem:[%s1766_s2 + $0x8] sm:$0xff]  ;;  %v55_v36 = vld [vmem:[%s1766_s2 + $0x10] sm:$0xff] }
   0xd   :  { %1126 = vmatprep.mubr.msk.f32.mxu0 %vm65_vm1, %v26_v7  ;;  %v1221_v35 = vpack.c.bf16 %v54_v34, %v53_v33  ;;  %v56_v37 = vld [vmem:[%s1766_s2 + $0x18] sm:$0xff]  ;;  %v1533_v39 = vld [vmem:[%s1767_s3] ss:$0 sm:$0xff] }
   0xe   :  { %v1225_v38 = vpack.c.bf16 %v56_v37, %v55_v36 }
   0xf   :  { %1222 = vmatprep.subr.bf16.mxu1 %v1221_v35 }
  0x10   :  { %1127 = vmatmul.mubr.msk.f32.gmra.mrb[6].mxu0 %vm65_vm1, %v27_v8  ;;  %1224 = vmatpush3.bf16.msra.mxu1 %v1221_v35 }
  0x11   :  { %1129 = vmatprep.mubr.msk.f32.mxu0 %vm65_vm1, %v28_v9  ;;  %1226 = vmatprep.subr.bf16.mxu1 %v1225_v38 }
  0x14   :  { %1130 = vmatmul.mubr.msk.f32.gmra.mrb[8].mxu0 %vm65_vm1, %v29_v10  ;;  %1228 = vmatpush3.bf16.msra.mxu1 %v1225_v38 }
  0x15   :  { %1132 = vmatprep.mubr.msk.f32.mxu0 %vm65_vm1, %v30_v11 }
  0x18   :  { %1133 = vmatmul.mubr.msk.f32.gmra.mrb[10].mxu0 %vm65_vm1, %v31_v12 }
  0x19   :  { %1135 = vmatprep.mubr.msk.f32.mxu0 %vm65_vm1, %v32_v13 }
  0x1c   :  { %1136 = vmatmul.mubr.msk.f32.gmra.mrb[12].mxu0 %vm65_vm1, %v33_v14 }
  0x1d   :  { %1138 = vmatprep.mubr.msk.f32.mxu0 %vm65_vm1, %v34_v15 }
  0x20   :  { %1139 = vmatmul.mubr.msk.f32.gmra.mrb[14].mxu0 %vm65_vm1, %v35_v16 }
  0x21   :  { %1141 = vmatprep.mubr.msk.f32.mxu0 %vm65_vm1, %v36_v17 }
  0x24   :  { %1142 = vmatmul.mubr.msk.f32.gmra.mrb[16].mxu0 %vm65_vm1, %v37_v18 }
  0x25   :  { %1144 = vmatprep.mubr.msk.f32.mxu0 %vm65_vm1, %v38_v19 }
  0x28   :  { %1145 = vmatmul.mubr.msk.f32.gmra.mrb[18].mxu0 %vm65_vm1, %v39_v20 }
  0x29   :  { %1147 = vmatprep.mubr.msk.f32.mxu0 %vm65_vm1, %v40_v21 }
  0x2c   :  { %1148 = vmatmul.mubr.msk.f32.gmra.mrb[20].mxu0 %vm65_vm1, %v41_v22 }
  0x2d   :  { %1150 = vmatprep.mubr.msk.f32.mxu0 %vm65_vm1, %v42_v23 }
  0x30   :  { %1151 = vmatmul.mubr.msk.f32.gmra.mrb[22].mxu0 %vm65_vm1, %v43_v24 }
  0x31   :  { %1153 = vmatprep.mubr.msk.f32.mxu0 %vm65_vm1, %v44_v25 }
  0x34   :  { %1154 = vmatmul.mubr.msk.f32.gmra.mrb[24].mxu0 %vm65_vm1, %v45_v26 }
  0x35   :  { %1156 = vmatprep.mubr.msk.f32.mxu0 %vm65_vm1, %v46_v27 }
  0x38   :  { %1157 = vmatmul.mubr.msk.f32.gmra.mrb[26].mxu0 %vm65_vm1, %v47_v28 }
  0x39   :  { %1159 = vmatprep.mubr.msk.f32.mxu0 %vm65_vm1, %v48_v29 }
  0x3c   :  { %1160 = vmatmul.mubr.msk.f32.gmra.mrb[28].mxu0 %vm65_vm1, %v49_v30 }
  0x3d   :  { %1162 = vmatprep.mubr.msk.f32.mxu0 %vm65_vm1, %v50_v31 }
  0x40   :  { %1163 = vmatmul.mubr.msk.f32.gmra.mrb[30].mxu0 %vm65_vm1, %v51_v32 }
  0xd7   :  { %v1119_v40 = vpop.f32.mrb[0].mxu0 }
  0xd8   :  { %v238_v41 = vadd.f32 %v1119_v40, %v1533_v39  ;;  %v232_v42 = vpop.f32.mrb[1].mxu0 }
  0xd9   :  { %v233_v43 = vadd.f32 %v1533_v39, %v232_v42 }
  0xda   :  { %v982_v44 = vmul.f32 -1.442695, %v238_v41 }
  0xdb   :  { %v981_v45 = vmul.f32 -1.442695, %v233_v43  ;;  %v1122_v46 = vpop.f32.mrb[2].mxu0 }
  0xdc   :  { %1229 = vpow2.f32 %v982_v44  ;;  %v248_v47 = vadd.f32 %v1122_v46, %v1533_v39  ;;  %v242_v48 = vpop.f32.mrb[3].mxu0 }
  0xdd   :  { %1231 = vpow2.f32 %v981_v45  ;;  %v243_v49 = vadd.f32 %v1533_v39, %v242_v48 }
  0xde   :  { %v984_v50 = vmul.f32 -1.442695, %v248_v47 }
  0xdf   :  { %v983_v51 = vmul.f32 -1.442695, %v243_v49  ;;  %v1125_v52 = vpop.f32.mrb[4].mxu0 }
  0xe0   :  { %1233 = vpow2.f32 %v984_v50  ;;  %v258_v53 = vadd.f32 %v1125_v52, %v1533_v39  ;;  %v252_v54 = vpop.f32.mrb[5].mxu0 }
  0xe1   :  { %1235 = vpow2.f32 %v983_v51  ;;  %v253_v55 = vadd.f32 %v1533_v39, %v252_v54 }
  0xe2   :  { %v986_v56 = vmul.f32 -1.442695, %v258_v53 }
  0xe3   :  { %v985_v57 = vmul.f32 -1.442695, %v253_v55  ;;  %v1128_v58 = vpop.f32.mrb[6].mxu0 }
  0xe4   :  { %1237 = vpow2.f32 %v986_v56  ;;  %v268_v59 = vadd.f32 %v1128_v58, %v1533_v39  ;;  %v262_v60 = vpop.f32.mrb[7].mxu0 }
  0xe5   :  { %1239 = vpow2.f32 %v985_v57  ;;  %v263_v61 = vadd.f32 %v1533_v39, %v262_v60 }
  0xe6   :  { %v1230_v62 = vpop.eup %1229  ;;  %v988_v63 = vmul.f32 -1.442695, %v268_v59 }
  0xe7   :  { %v1232_v0 = vpop.eup %1231  ;;  %v488_v1 = vadd.f32 1.0, %v1230_v62  ;;  %v987_v2 = vmul.f32 -1.442695, %v263_v61  ;;  %v1131_v3 = vpop.f32.mrb[8].mxu0 }
  0xe8   :  { %v487_v4 = vadd.f32 1.0, %v1232_v0  ;;  %1241 = vpow2.f32 %v988_v63  ;;  %v278_v5 = vadd.f32 %v1131_v3, %v1533_v39  ;;  %v272_v6 = vpop.f32.mrb[9].mxu0 }
  0xe9   :  { %1243 = vrcp.f32 %v488_v1  ;;  %v273_v7 = vadd.f32 %v1533_v39, %v272_v6 }
  0xea   :  { %v1234_v8 = vpop.eup %1233  ;;  %1245 = vrcp.f32 %v487_v4  ;;  %v990_v9 = vmul.f32 -1.442695, %v278_v5 }
  0xeb   :  { %v1236_v10 = vpop.eup %1235  ;;  %v490_v11 = vadd.f32 1.0, %v1234_v8  ;;  %1247 = vpow2.f32 %v987_v2  ;;  %v989_v12 = vmul.f32 -1.442695, %v273_v7  ;;  %v1134_v13 = vpop.f32.mrb[10].mxu0 }
  0xec   :  { %v489_v14 = vadd.f32 1.0, %v1236_v10  ;;  %1249 = vpow2.f32 %v990_v9  ;;  %v288_v15 = vadd.f32 %v1134_v13, %v1533_v39  ;;  %v282_v16 = vpop.f32.mrb[11].mxu0 }
  0xed   :  { %1251 = vrcp.f32 %v490_v11  ;;  %v283_v17 = vadd.f32 %v1533_v39, %v282_v16 }
  0xee   :  { %v1238_v18 = vpop.eup %1237  ;;  %1253 = vrcp.f32 %v489_v14  ;;  %v992_v19 = vmul.f32 -1.442695, %v288_v15 }
  0xef   :  { %v1240_v20 = vpop.eup %1239  ;;  %v492_v21 = vadd.f32 1.0, %v1238_v18  ;;  %1255 = vpow2.f32 %v989_v12  ;;  %v991_v22 = vmul.f32 -1.442695, %v283_v17  ;;  %v1137_v23 = vpop.f32.mrb[12].mxu0 }
  0xf0   :  { %v491_v24 = vadd.f32 1.0, %v1240_v20  ;;  %1257 = vpow2.f32 %v992_v19  ;;  %v298_v25 = vadd.f32 %v1137_v23, %v1533_v39  ;;  %v292_v26 = vpop.f32.mrb[13].mxu0 }
  0xf1   :  { %1259 = vrcp.f32 %v492_v21  ;;  %v293_v27 = vadd.f32 %v1533_v39, %v292_v26 }
  0xf2   :  { %v1242_v28 = vpop.eup %1241  ;;  %1261 = vrcp.f32 %v491_v24  ;;  %v994_v29 = vmul.f32 -1.442695, %v298_v25 }
  0xf3   :  { %v1244_v30 = vpop.eup %1243  ;;  %v494_v31 = vadd.f32 1.0, %v1242_v28  ;;  %1263 = vpow2.f32 %v991_v22  ;;  %v993_v32 = vmul.f32 -1.442695, %v293_v27  ;;  %v1140_v33 = vpop.f32.mrb[14].mxu0 }
  0xf4   :  { %v1246_v34 = vpop.eup %1245  ;;  %1265 = vpow2.f32 %v994_v29  ;;  %v308_v35 = vadd.f32 %v1140_v33, %v1533_v39  ;;  %v302_v36 = vpop.f32.mrb[15].mxu0 }
  0xf5   :  { %v1248_v37 = vpop.eup %1247  ;;  %v303_v38 = vadd.f32 %v1533_v39, %v302_v36  ;;  %1173 = vmatprep.mubr.msk.f32.mxu1 %vm589_vm2, %v1246_v34  ;;  %1267 = vpow2.f32 %v993_v32 }
  0xf6   :  { %v1250_v40 = vpop.eup %1249  ;;  %v493_v41 = vadd.f32 1.0, %v1248_v37  ;;  %v996_v42 = vmul.f32 -1.442695, %v308_v35  ;;  %1174 = vmatmul.mubr.msk.f32.vlgmr.msra.gmra.mrb[0].mxu1 %vm589_vm2, %v1244_v30  ;;  %1269 = vrcp.f32 %v494_v31 }
  0xf7   :  { %v1252_v43 = vpop.eup %1251  ;;  %v496_v44 = vadd.f32 1.0, %v1250_v40  ;;  %v995_v45 = vmul.f32 -1.442695, %v303_v38  ;;  %v1143_v46 = vpop.f32.mrb[16].mxu0 }
  0xf8   :  { %v1254_v47 = vpop.eup %1253  ;;  %1271 = vrcp.f32 %v493_v41  ;;  %v318_v48 = vadd.f32 %v1143_v46, %v1533_v39  ;;  %v312_v49 = vpop.f32.mrb[17].mxu0 }
  0xf9   :  { %v1256_v50 = vpop.eup %1255  ;;  %1273 = vrcp.f32 %v496_v44  ;;  %v313_v51 = vadd.f32 %v1533_v39, %v312_v49  ;;  %1176 = vmatprep.mubr.msk.f32.mxu1 %vm589_vm2, %v1254_v47 }
  0xfa   :  { %v1258_v52 = vpop.eup %1257  ;;  %v495_v53 = vadd.f32 1.0, %v1256_v50  ;;  %1275 = vpow2.f32 %v996_v42  ;;  %v998_v54 = vmul.f32 -1.442695, %v318_v48  ;;  %1177 = vmatmul.mubr.msk.f32.gmra.mrb[2].mxu1 %vm589_vm2, %v1252_v43 }
  0xfb   :  { %v1260_v55 = vpop.eup %1259  ;;  %v498_v56 = vadd.f32 1.0, %v1258_v52  ;;  %1277 = vpow2.f32 %v995_v45  ;;  %v997_v57 = vmul.f32 -1.442695, %v313_v51  ;;  %v1146_v58 = vpop.f32.mrb[18].mxu0 }
  0xfc   :  { %v1262_v59 = vpop.eup %1261  ;;  %1279 = vrcp.f32 %v495_v53  ;;  %v328_v60 = vadd.f32 %v1146_v58, %v1533_v39  ;;  %v322_v61 = vpop.f32.mrb[19].mxu0 }
  0xfd   :  { %v1264_v62 = vpop.eup %1263  ;;  %1281 = vrcp.f32 %v498_v56  ;;  %v323_v63 = vadd.f32 %v1533_v39, %v322_v61  ;;  %1179 = vmatprep.mubr.msk.f32.mxu1 %vm589_vm2, %v1262_v59 }
  0xfe   :  { %v1266_v0 = vpop.eup %1265  ;;  %v497_v1 = vadd.f32 1.0, %v1264_v62  ;;  %1283 = vpow2.f32 %v998_v54  ;;  %v1000_v2 = vmul.f32 -1.442695, %v328_v60  ;;  %1180 = vmatmul.mubr.msk.f32.gmra.mrb[4].mxu1 %vm589_vm2, %v1260_v55 }
  0xff   :  { %v500_v3 = vadd.f32 1.0, %v1266_v0  ;;  %1285 = vpow2.f32 %v997_v57  ;;  %v1149_v4 = vpop.f32.mrb[20].mxu0  ;;  %v1268_v5 = vpop.eup %1267  ;;  %v999_v6 = vmul.f32 -1.442695, %v323_v63 }
 0x100   :  { %1287 = vrcp.f32 %v497_v1  ;;  %v338_v7 = vadd.f32 %v1149_v4, %v1533_v39  ;;  %v332_v8 = vpop.f32.mrb[21].mxu0  ;;  %v1270_v9 = vpop.eup %1269  ;;  %v499_v10 = vadd.f32 1.0, %v1268_v5 }
 0x101   :  { %1289 = vrcp.f32 %v500_v3  ;;  %v333_v11 = vadd.f32 %v1533_v39, %v332_v8 }
 0x102   :  { %v1272_v12 = vpop.eup %1271  ;;  %1291 = vpow2.f32 %v1000_v2  ;;  %v1002_v13 = vmul.f32 -1.442695, %v338_v7 }
 0x103   :  { %v1274_v14 = vpop.eup %1273  ;;  %1293 = vrcp.f32 %v499_v10  ;;  %v1001_v15 = vmul.f32 -1.442695, %v333_v11  ;;  %1182 = vmatprep.mubr.msk.f32.mxu1 %vm589_vm2, %v1272_v12  ;;  %v1152_v16 = vpop.f32.mrb[22].mxu0 }
 0x104   :  { %v1276_v17 = vpop.eup %1275  ;;  %1295 = vpow2.f32 %v999_v6  ;;  %1183 = vmatmul.mubr.msk.f32.gmra.mrb[6].mxu1 %vm589_vm2, %v1270_v9  ;;  %v348_v18 = vadd.f32 %v1152_v16, %v1533_v39  ;;  %v342_v19 = vpop.f32.mrb[23].mxu0 }
 0x105   :  { %v1278_v20 = vpop.eup %1277  ;;  %v502_v21 = vadd.f32 1.0, %v1276_v17  ;;  %1297 = vpow2.f32 %v1002_v13  ;;  %v343_v22 = vadd.f32 %v1533_v39, %v342_v19 }
 0x106   :  { %v1280_v23 = vpop.eup %1279  ;;  %v501_v24 = vadd.f32 1.0, %v1278_v20  ;;  %1299 = vpow2.f32 %v1001_v15  ;;  %v1004_v25 = vmul.f32 -1.442695, %v348_v18 }
 0x107   :  { %v1282_v26 = vpop.eup %1281  ;;  %1301 = vrcp.f32 %v502_v21  ;;  %v1003_v27 = vmul.f32 -1.442695, %v343_v22  ;;  %1185 = vmatprep.mubr.msk.f32.mxu1 %vm589_vm2, %v1280_v23  ;;  %v1155_v28 = vpop.f32.mrb[24].mxu0 }
 0x108   :  { %v1284_v29 = vpop.eup %1283  ;;  %1303 = vrcp.f32 %v501_v24  ;;  %1186 = vmatmul.mubr.msk.f32.gmra.mrb[8].mxu1 %vm589_vm2, %v1274_v14  ;;  %v358_v30 = vadd.f32 %v1155_v28, %v1533_v39  ;;  %v352_v31 = vpop.f32.mrb[25].mxu0 }
 0x109   :  { %v1286_v32 = vpop.eup %1285  ;;  %v504_v33 = vadd.f32 1.0, %v1284_v29  ;;  %1305 = vpow2.f32 %v1004_v25  ;;  %v353_v34 = vadd.f32 %v1533_v39, %v352_v31 }
 0x10a   :  { %v1288_v35 = vpop.eup %1287  ;;  %v503_v36 = vadd.f32 1.0, %v1286_v32  ;;  %1307 = vpow2.f32 %v1003_v27  ;;  %v1006_v37 = vmul.f32 -1.442695, %v358_v30 }
 0x10b   :  { %v1290_v38 = vpop.eup %1289  ;;  %1309 = vrcp.f32 %v504_v33  ;;  %v1005_v40 = vmul.f32 -1.442695, %v353_v34  ;;  %1188 = vmatprep.mubr.msk.f32.mxu1 %vm589_vm2, %v1288_v35  ;;  %v1158_v41 = vpop.f32.mrb[26].mxu0 }
 0x10c   :  { %v1292_v42 = vpop.eup %1291  ;;  %1311 = vrcp.f32 %v503_v36  ;;  %1189 = vmatmul.mubr.msk.f32.gmra.mrb[10].mxu1 %vm589_vm2, %v1282_v26  ;;  %v368_v43 = vadd.f32 %v1158_v41, %v1533_v39  ;;  %v362_v44 = vpop.f32.mrb[27].mxu0 }
 0x10d   :  { %v1294_v45 = vpop.eup %1293  ;;  %1313 = vpow2.f32 %v1006_v37  ;;  %v363_v46 = vadd.f32 %v1533_v39, %v362_v44  ;;  %v506_v48 = vadd.f32 1.0, %v1292_v42  ;;  %v1602_v42 = vld [vmem:[%s1768_s4] ss:$0 sm:$0xff] }
 0x10e   :  { %v1296_v47 = vpop.eup %1295  ;;  %1315 = vpow2.f32 %v1005_v40  ;;  %v1008_v49 = vmul.f32 -1.442695, %v368_v43  ;;  %1191 = vmatprep.mubr.msk.f32.mxu1 %vm589_vm2, %v1294_v45 }
 0x10f   :  { %v1298_v50 = vpop.eup %1297  ;;  %v505_v51 = vadd.f32 1.0, %v1296_v47  ;;  %v1161_v52 = vpop.f32.mrb[28].mxu0  ;;  %v1007_v54 = vmul.f32 -1.442695, %v363_v46 }
 0x110   :  { %v1300_v53 = vpop.eup %1299  ;;  %1317 = vpow2.f32 %v1008_v49  ;;  %1192 = vmatmul.mubr.msk.f32.gmra.mrb[12].mxu1 %vm589_vm2, %v1290_v38  ;;  %v378_v55 = vadd.f32 %v1161_v52, %v1533_v39  ;;  %v372_v56 = vpop.f32.mrb[29].mxu0  ;;  %v508_v61 = vadd.f32 1.0, %v1298_v50 }
 0x111   :  { %v1302_v57 = vpop.eup %1301  ;;  %1319 = vrcp.f32 %v505_v51  ;;  %v507_v58 = vadd.f32 1.0, %v1300_v53  ;;  %v373_v59 = vadd.f32 %v1533_v39, %v372_v56 }
 0x112   :  { %v1304_v60 = vpop.eup %1303  ;;  %1321 = vrcp.f32 %v506_v48  ;;  %v1010_v62 = vmul.f32 -1.442695, %v378_v55 }
 0x113   :  { %v1306_v63 = vpop.eup %1305  ;;  %1323 = vrcp.f32 %v507_v58  ;;  %1194 = vmatprep.mubr.msk.f32.mxu1 %vm589_vm2, %v1304_v60  ;;  %v1164_v0 = vpop.f32.mrb[30].mxu0  ;;  %v1009_v2 = vmul.f32 -1.442695, %v373_v59 }
 0x114   :  { %v1308_v1 = vpop.eup %1307  ;;  %1325 = vpow2.f32 %v1007_v54  ;;  %1195 = vmatmul.mubr.msk.f32.gmra.mrb[14].mxu1 %vm589_vm2, %v1302_v57  ;;  %v388_v3 = vadd.f32 %v1164_v0, %v1533_v39  ;;  %v382_v4 = vpop.f32.mrb[31].mxu0  ;;  %v510_v9 = vadd.f32 1.0, %v1306_v63 }
 0x115   :  { %v1310_v5 = vpop.eup %1309  ;;  %v509_v6 = vadd.f32 1.0, %v1308_v1  ;;  %1327 = vpow2.f32 %v1010_v62  ;;  %v383_v7 = vadd.f32 %v1533_v39, %v382_v4 }
 0x116   :  { %v1312_v8 = vpop.eup %1311  ;;  %1329 = vrcp.f32 %v508_v61  ;;  %v1012_v10 = vmul.f32 -1.442695, %v388_v3 }
 0x117   :  { %v1314_v11 = vpop.eup %1313  ;;  %1331 = vrcp.f32 %v509_v6  ;;  %1197 = vmatprep.mubr.msk.f32.mxu1 %vm589_vm2, %v1312_v8  ;;  %v1011_v13 = vmul.f32 -1.442695, %v383_v7 }
 0x118   :  { %v1316_v12 = vpop.eup %1315  ;;  %1333 = vpow2.f32 %v1009_v2  ;;  %1198 = vmatmul.mubr.msk.f32.gmra.mrb[16].mxu1 %vm589_vm2, %v1310_v5  ;;  %v512_v16 = vadd.f32 1.0, %v1314_v11 }
 0x119   :  { %v511_v14 = vadd.f32 1.0, %v1316_v12  ;;  %1335 = vpow2.f32 %v1012_v10 }
 0x11a   :  { %v1318_v15 = vpop.eup %1317  ;;  %1337 = vrcp.f32 %v510_v9 }
 0x11b   :  { %v1320_v17 = vpop.eup %1319  ;;  %1339 = vrcp.f32 %v511_v14  ;;  %v514_v20 = vadd.f32 1.0, %v1318_v15 }
 0x11c   :  { %v1322_v39 = vpop.eup %1321  ;;  %1341 = vpow2.f32 %v1011_v13  ;;  %1200 = vmatprep.mubr.msk.f32.mxu1 %vm589_vm2, %v1320_v17 }
 0x11d   :  { %v1324_v18 = vpop.eup %1323  ;;  %1201 = vmatmul.mubr.msk.f32.gmra.mrb[18].mxu1 %vm589_vm2, %v1322_v39  ;;  %1343 = vrcp.f32 %v512_v16 }
 0x11e   :  { %v1326_v19 = vpop.eup %1325  ;;  %1203 = vmatprep.mubr.msk.f32.mxu1 %vm589_vm2, %v1324_v18 }
 0x11f   :  { %v1328_v21 = vpop.eup %1327  ;;  %v513_v22 = vadd.f32 1.0, %v1326_v19 }
 0x120   :  { %v1330_v23 = vpop.eup %1329  ;;  %v516_v26 = vadd.f32 1.0, %v1328_v21 }
 0x121   :  { %v1332_v24 = vpop.eup %1331  ;;  %1345 = vrcp.f32 %v513_v22  ;;  %1204 = vmatmul.mubr.msk.f32.gmra.mrb[20].mxu1 %vm589_vm2, %v1330_v23 }
 0x122   :  { %v1334_v25 = vpop.eup %1333  ;;  %1347 = vrcp.f32 %v514_v20  ;;  %1206 = vmatprep.mubr.msk.f32.mxu1 %vm589_vm2, %v1332_v24 }
 0x123   :  { %v1336_v27 = vpop.eup %1335  ;;  %v515_v28 = vadd.f32 1.0, %v1334_v25 }
 0x124   :  { %v1338_v29 = vpop.eup %1337  ;;  %v518_v32 = vadd.f32 1.0, %v1336_v27 }
 0x125   :  { %v1340_v30 = vpop.eup %1339  ;;  %1349 = vrcp.f32 %v515_v28  ;;  %1207 = vmatmul.mubr.msk.f32.gmra.mrb[22].mxu1 %vm589_vm2, %v1338_v29 }
 0x126   :  { %v1342_v31 = vpop.eup %1341  ;;  %1351 = vrcp.f32 %v516_v26  ;;  %1209 = vmatprep.mubr.msk.f32.mxu1 %vm589_vm2, %v1340_v30 }
 0x127   :  { %v517_v33 = vadd.f32 1.0, %v1342_v31  ;;  %v1344_v34 = vpop.eup %1343 }
 0x129   :  { %1353 = vrcp.f32 %v517_v33  ;;  %1210 = vmatmul.mubr.msk.f32.gmra.mrb[24].mxu1 %vm589_vm2, %v1344_v34 }
 0x12a   :  { %1355 = vrcp.f32 %v518_v32 }
 0x12b   :  { %v1346_v35 = vpop.eup %1345 }
 0x12c   :  { %v1348_v36 = vpop.eup %1347  ;;  %1212 = vmatprep.mubr.msk.f32.mxu1 %vm589_vm2, %v1346_v35 }
 0x12d   :  { %1213 = vmatmul.mubr.msk.f32.gmra.mrb[26].mxu1 %vm589_vm2, %v1348_v36 }
 0x12f   :  { %v1350_v37 = vpop.eup %1349 }
 0x130   :  { %v1352_v38 = vpop.eup %1351  ;;  %1215 = vmatprep.mubr.msk.f32.mxu1 %vm589_vm2, %v1350_v37 }
 0x131   :  { %1216 = vmatmul.mubr.msk.f32.gmra.mrb[28].mxu1 %vm589_vm2, %v1352_v38 }
 0x133   :  { %v1354_v40 = vpop.eup %1353 }
 0x134   :  { %v1356_v41 = vpop.eup %1355  ;;  %1218 = vmatprep.mubr.msk.f32.mxu1 %vm589_vm2, %v1354_v40 }
 0x135   :  { %1219 = vmatmul.mubr.msk.f32.gmra.mrb[30].mxu1 %vm589_vm2, %v1356_v41 }
 0x1c9   :  { %v1175_v43 = vpop.f32.mrb[0].mxu1 }
 0x1ca   :  { %v758_v44 = vadd.f32 %v1175_v43, %v1602_v42  ;;  %v752_v45 = vpop.f32.mrb[1].mxu1 }
 0x1cb   :  { %v753_v46 = vadd.f32 %v1602_v42, %v752_v45 }
 0x1cc   :  { %912 = vst.msk [vmem:[%s1769_s5 + $0x8] sm:$0xff] %vm65_vm1, %v758_v44 }
 0x1cd   :  { %911 = vst.msk [vmem:[%s1769_s5] sm:$0xff] %vm65_vm1, %v753_v46  ;;  %v1178_v47 = vpop.f32.mrb[2].mxu1 }
 0x1ce   :  { %v768_v48 = vadd.f32 %v1178_v47, %v1602_v42  ;;  %v762_v49 = vpop.f32.mrb[3].mxu1 }
 0x1cf   :  { %v763_v50 = vadd.f32 %v1602_v42, %v762_v49 }
 0x1d0   :  { %914 = vst.msk [vmem:[%s1769_s5 + $0x18] sm:$0xff] %vm65_vm1, %v768_v48 }
 0x1d1   :  { %913 = vst.msk [vmem:[%s1769_s5 + $0x10] sm:$0xff] %vm65_vm1, %v763_v50  ;;  %v1181_v51 = vpop.f32.mrb[4].mxu1 }
 0x1d2   :  { %v778_v52 = vadd.f32 %v1181_v51, %v1602_v42  ;;  %v772_v53 = vpop.f32.mrb[5].mxu1 }
 0x1d3   :  { %v773_v54 = vadd.f32 %v1602_v42, %v772_v53 }
 0x1d4   :  { %916 = vst.msk [vmem:[%s1769_s5 + $0x28] sm:$0xff] %vm65_vm1, %v778_v52 }
 0x1d5   :  { %915 = vst.msk [vmem:[%s1769_s5 + $0x20] sm:$0xff] %vm65_vm1, %v773_v54 }
 0x1d7   :  { %v1184_v55 = vpop.f32.mrb[6].mxu1 }
 0x1d8   :  { %v788_v56 = vadd.f32 %v1184_v55, %v1602_v42  ;;  %v782_v57 = vpop.f32.mrb[7].mxu1 }
 0x1d9   :  { %v783_v58 = vadd.f32 %v1602_v42, %v782_v57 }
 0x1da   :  { %918 = vst.msk [vmem:[%s1769_s5 + $0x38] sm:$0xff] %vm65_vm1, %v788_v56 }
 0x1db   :  { %917 = vst.msk [vmem:[%s1769_s5 + $0x30] sm:$0xff] %vm65_vm1, %v783_v58  ;;  %v1187_v59 = vpop.f32.mrb[8].mxu1 }
 0x1dc   :  { %v798_v60 = vadd.f32 %v1187_v59, %v1602_v42  ;;  %v792_v61 = vpop.f32.mrb[9].mxu1 }
 0x1dd   :  { %v793_v62 = vadd.f32 %v1602_v42, %v792_v61 }
 0x1de   :  { %920 = vst.msk [vmem:[%s1769_s5 + $0x48] sm:$0xff] %vm65_vm1, %v798_v60 }
 0x1df   :  { %919 = vst.msk [vmem:[%s1769_s5 + $0x40] sm:$0xff] %vm65_vm1, %v793_v62  ;;  %v1190_v63 = vpop.f32.mrb[10].mxu1 }
 0x1e0   :  { %v808_v0 = vadd.f32 %v1190_v63, %v1602_v42  ;;  %v802_v1 = vpop.f32.mrb[11].mxu1 }
 0x1e1   :  { %v803_v2 = vadd.f32 %v1602_v42, %v802_v1 }
 0x1e2   :  { %922 = vst.msk [vmem:[%s1769_s5 + $0x58] sm:$0xff] %vm65_vm1, %v808_v0 }
 0x1e3   :  { %921 = vst.msk [vmem:[%s1769_s5 + $0x50] sm:$0xff] %vm65_vm1, %v803_v2  ;;  %v1193_v3 = vpop.f32.mrb[12].mxu1 }
 0x1e4   :  { %v818_v4 = vadd.f32 %v1193_v3, %v1602_v42  ;;  %v812_v5 = vpop.f32.mrb[13].mxu1 }
 0x1e5   :  { %v813_v6 = vadd.f32 %v1602_v42, %v812_v5 }
 0x1e6   :  { %924 = vst.msk [vmem:[%s1769_s5 + $0x68] sm:$0xff] %vm65_vm1, %v818_v4 }
 0x1e7   :  { %923 = vst.msk [vmem:[%s1769_s5 + $0x60] sm:$0xff] %vm65_vm1, %v813_v6  ;;  %v1196_v7 = vpop.f32.mrb[14].mxu1 }
 0x1e8   :  { %v828_v8 = vadd.f32 %v1196_v7, %v1602_v42  ;;  %v822_v9 = vpop.f32.mrb[15].mxu1 }
 0x1e9   :  { %v823_v10 = vadd.f32 %v1602_v42, %v822_v9 }
 0x1ea   :  { %926 = vst.msk [vmem:[%s1769_s5 + $0x78] sm:$0xff] %vm65_vm1, %v828_v8 }
 0x1eb   :  { %925 = vst.msk [vmem:[%s1769_s5 + $0x70] sm:$0xff] %vm65_vm1, %v823_v10  ;;  %v1199_v11 = vpop.f32.mrb[16].mxu1 }
 0x1ec   :  { %v838_v12 = vadd.f32 %v1199_v11, %v1602_v42  ;;  %v832_v13 = vpop.f32.mrb[17].mxu1 }
 0x1ed   :  { %v833_v14 = vadd.f32 %v1602_v42, %v832_v13 }
 0x1ee   :  { %928 = vst.msk [vmem:[%s1769_s5 + $0x88] sm:$0xff] %vm65_vm1, %v838_v12 }
 0x1ef   :  { %927 = vst.msk [vmem:[%s1769_s5 + $0x80] sm:$0xff] %vm65_vm1, %v833_v14 }
 0x1f0   :  { %v1202_v15 = vpop.f32.mrb[18].mxu1 }
 0x1f1   :  { %v848_v16 = vadd.f32 %v1202_v15, %v1602_v42  ;;  %v842_v17 = vpop.f32.mrb[19].mxu1 }
 0x1f2   :  { %v843_v39 = vadd.f32 %v1602_v42, %v842_v17 }
 0x1f3   :  { %930 = vst.msk [vmem:[%s1769_s5 + $0x98] sm:$0xff] %vm65_vm1, %v848_v16 }
 0x1f4   :  { %929 = vst.msk [vmem:[%s1769_s5 + $0x90] sm:$0xff] %vm65_vm1, %v843_v39  ;;  %v1205_v18 = vpop.f32.mrb[20].mxu1 }
 0x1f5   :  { %v858_v19 = vadd.f32 %v1205_v18, %v1602_v42  ;;  %v852_v20 = vpop.f32.mrb[21].mxu1 }
 0x1f6   :  { %v853_v21 = vadd.f32 %v1602_v42, %v852_v20 }
 0x1f7   :  { %932 = vst.msk [vmem:[%s1769_s5 + $0xa8] sm:$0xff] %vm65_vm1, %v858_v19 }
 0x1f8   :  { %931 = vst.msk [vmem:[%s1769_s5 + $0xa0] sm:$0xff] %vm65_vm1, %v853_v21  ;;  %v1208_v22 = vpop.f32.mrb[22].mxu1 }
 0x1f9   :  { %v868_v23 = vadd.f32 %v1208_v22, %v1602_v42  ;;  %v862_v24 = vpop.f32.mrb[23].mxu1 }
 0x1fa   :  { %v863_v25 = vadd.f32 %v1602_v42, %v862_v24 }
 0x1fb   :  { %934 = vst.msk [vmem:[%s1769_s5 + $0xb8] sm:$0xff] %vm65_vm1, %v868_v23 }
 0x1fc   :  { %933 = vst.msk [vmem:[%s1769_s5 + $0xb0] sm:$0xff] %vm65_vm1, %v863_v25  ;;  %v1211_v26 = vpop.f32.mrb[24].mxu1 }
 0x1fd   :  { %v878_v27 = vadd.f32 %v1211_v26, %v1602_v42  ;;  %v872_v28 = vpop.f32.mrb[25].mxu1 }
 0x1fe   :  { %v873_v29 = vadd.f32 %v1602_v42, %v872_v28 }
 0x1ff   :  { %936 = vst.msk [vmem:[%s1769_s5 + $0xc8] sm:$0xff] %vm65_vm1, %v878_v27 }
 0x200   :  { %935 = vst.msk [vmem:[%s1769_s5 + $0xc0] sm:$0xff] %vm65_vm1, %v873_v29  ;;  %v1214_v30 = vpop.f32.mrb[26].mxu1 }
 0x201   :  { %v888_v31 = vadd.f32 %v1214_v30, %v1602_v42  ;;  %v882_v32 = vpop.f32.mrb[27].mxu1 }
 0x202   :  { %v883_v33 = vadd.f32 %v1602_v42, %v882_v32 }
 0x203   :  { %938 = vst.msk [vmem:[%s1769_s5 + $0xd8] sm:$0xff] %vm65_vm1, %v888_v31 }
 0x204   :  { %937 = vst.msk [vmem:[%s1769_s5 + $0xd0] sm:$0xff] %vm65_vm1, %v883_v33  ;;  %v1217_v34 = vpop.f32.mrb[28].mxu1 }
 0x205   :  { %v898_v35 = vadd.f32 %v1217_v34, %v1602_v42  ;;  %v892_v36 = vpop.f32.mrb[29].mxu1 }
 0x206   :  { %v893_v37 = vadd.f32 %v1602_v42, %v892_v36 }
 0x207   :  { %940 = vst.msk [vmem:[%s1769_s5 + $0xe8] sm:$0xff] %vm65_vm1, %v898_v35 }
 0x208   :  { %939 = vst.msk [vmem:[%s1769_s5 + $0xe0] sm:$0xff] %vm65_vm1, %v893_v37  ;;  %v1220_v38 = vpop.f32.mrb[30].mxu1 }
 0x209   :  { %v908_v40 = vadd.f32 %v1220_v38, %v1602_v42  ;;  %v902_v41 = vpop.f32.mrb[31].mxu1 }
 0x20a   :  { %v903_v43 = vadd.f32 %v1602_v42, %v902_v41 }
 0x20b   :  { %942 = vst.msk [vmem:[%s1769_s5 + $0xf8] sm:$0xff] %vm65_vm1, %v908_v40 }
 0x20c   :  { %941 = vst.msk [vmem:[%s1769_s5 + $0xf0] sm:$0xff] %vm65_vm1, %v903_v43 }

</bundles_post_ra>
